<compile_context>
chip_gen: v6e
topology: v6e:2x2x1
jax: 0.10.0
libtpu: 0.0.40
codegen_flags: <defaults>
</compile_context>

<pallas_src>
import functools

import jax
import jax.numpy as jnp
from jax.experimental import pallas as pl
from jax.experimental.pallas import tpu as pltpu

_MIB = 1024 * 1024


def _round_up(x, m):
    return ((x + m - 1) // m) * m


def _cdiv(a, b):
    return -(-a // b)


def _vmem_capacity_bytes():
    """Physical VMEM per core; falls back to the smallest generation (v7x)."""
    try:
        return int(pltpu.get_tpu_info().vmem_capacity_bytes)
    except Exception:
        return 64 * _MIB


def _vmem_budgets():
    """Generation-aware (scoped-vmem-limit, per-input-buffer) byte budgets."""
    cap = _vmem_capacity_bytes()
    # Leave ~8 MiB headroom below physical VMEM; never request more than
    # 112 MiB (v5e/v6e have 128 MiB physical, v7x has 64 MiB -> 56 MiB limit).
    vmem_limit = min(cap - 8 * _MIB, 112 * _MIB)
    # Double-buffered x tiles dominate usage: budget ~1/3 of the scoped limit
    # per buffer, capped at 16 MiB (enough for >85% of HBM roofline on all
    # generations with ~0.35us per-step overhead).
    per_buffer = min(16 * _MIB, max(2 * _MIB, (vmem_limit - 8 * _MIB) // 3))
    return int(vmem_limit), int(per_buffer)


def _choose_hw_tile(C, HW, itemsize, per_buffer_bytes):
    """Largest lane-dense (multiple-of-128) HW tile within the byte budget.

    Note: the tile is clamped to >=128 lanes, so extremely large C could still
    exceed the budget for a single minimal block (compile-time failure rather
    than graceful degradation); fine for realistic channel counts."""
    if HW <= 128:
        return HW  # block equals full array dim -> always a legal block shape
    max_lanes = max(128, per_buffer_bytes // (C * itemsize))
    cap = min(max_lanes, _round_up(HW, 128))
    cap = max(128, (cap // 128) * 128)
    num_tiles = _cdiv(HW, cap)
    tile = _round_up(_cdiv(HW, num_tiles), 128)
    return min(tile, cap)


def _sae_reduce_kernel(x_ref, w_stack_ref, wf_t_ref, att_ref, acc_ref,
                       *, hw, hw_tile):
    """Grid: (B 'parallel', HW-tiles 'arbitrary').

    x_ref:       (1, C, hw_tile)  current spatial tile of one batch element
    w_stack_ref: (C, 4*hidden)    concat([W1.T, W2.T, W3.T, W4.T], 1), resident
    wf_t_ref:    (4*hidden, C)    Wf.T, resident
    att_ref:     (1, 1, C)        per-batch attention output (last step only)
    acc_ref:     (1, C) f32       running spatial sum
    """
    k = pl.program_id(1)
    nk = pl.num_programs(1)

    @pl.when(k == 0)
    def _init():
        acc_ref[...] = jnp.zeros_like(acc_ref)

    ragged = (hw % hw_tile) != 0  # static python bool

    def _accumulate(masked):
        x = x_ref[...]                                   # (1, C, hw_tile)
        if masked:
            # Last tile is ragged: lanes past the true spatial extent are
            # undefined block-padding reads and must be masked out.
            lane = jax.lax.broadcasted_iota(jnp.int32, x.shape, dimension=2)
            valid = (k * hw_tile + lane) < hw
            x = jnp.where(valid, x, jnp.zeros((), dtype=x.dtype))
        acc_ref[...] += jnp.sum(x, axis=-1, dtype=jnp.float32)

    if ragged:
        # Steady-state tiles: plain unmasked sum (no per-element iota/select).
        @pl.when(k < nk - 1)
        def _steady():
            _accumulate(False)

        # Only the final tile pays for the mask.
        @pl.when(k == nk - 1)
        def _last():
            _accumulate(True)
    else:
        _accumulate(False)

    @pl.when(k == nk - 1)
    def _finalize():
        y = acc_ref[...] * jnp.float32(1.0 / hw)         # (1, C) global avg pool
        # fc1..fc4 (bias-free Linear + ReLU) fused into one stacked matmul.
        y_cat = jnp.maximum(
            jnp.dot(y, w_stack_ref[...], preferred_element_type=jnp.float32),
            0.0)
        # Final bias-free Linear + Sigmoid.
        logits = jnp.dot(y_cat, wf_t_ref[...],
                         preferred_element_type=jnp.float32)
        att_ref[...] = jax.nn.sigmoid(logits)[None].astype(att_ref.dtype)


def prepare_sae_weights(w1, w2, w3, w4, wf):
    """One-time weight preprocessing (hoisted out of the per-call path).

    w1..w4: (hidden, C) PyTorch Linear weights.  wf: (C, 4*hidden)."""
    w_stack = jnp.concatenate([w1.T, w2.T, w3.T, w4.T], axis=1)  # (C, 4h)
    wf_t = wf.T                                                   # (4h, C)
    return w_stack, wf_t


def sae_attention(x, w_stack, wf_t, *, hw_tile=None):
    """Returns the (B, C) channel attention (sigmoid output)."""
    B, C, H, W = x.shape
    HW = H * W
    four_h = w_stack.shape[1]
    x3 = x.reshape(B, C, HW)

    vmem_limit, per_buffer = _vmem_budgets()
    itemsize = jnp.dtype(x.dtype).itemsize
    if hw_tile is None:
        hw_tile = _choose_hw_tile(C, HW, itemsize, per_buffer)
    num_tiles = _cdiv(HW, hw_tile)

    kernel = functools.partial(_sae_reduce_kernel, hw=HW, hw_tile=hw_tile)

    cost = pl.CostEstimate(
        flops=B * C * HW + 2 * B * C * four_h + 2 * B * four_h * C,
        transcendentals=B * C,
        bytes_accessed=(x3.size * itemsize
                        + (w_stack.size + wf_t.size)
                        * jnp.dtype(w_stack.dtype).itemsize
                        + B * C * itemsize),
    )

    att = pl.pallas_call(
        kernel,
        out_shape=jax.ShapeDtypeStruct((B, 1, C), x.dtype),
        grid_spec=pltpu.PrefetchScalarGridSpec(
            num_scalar_prefetch=0,
            grid=(B, num_tiles),
            in_specs=[
                pl.BlockSpec((1, C, hw_tile), lambda b, k: (b, 0, k)),
                pl.BlockSpec((C, four_h), lambda b, k: (0, 0)),   # resident
                pl.BlockSpec((four_h, C), lambda b, k: (0, 0)),   # resident
            ],
            out_specs=pl.BlockSpec((1, 1, C), lambda b, k: (b, 0, 0)),
            scratch_shapes=[pltpu.VMEM((1, C), jnp.float32)],
        ),
        compiler_params=pltpu.CompilerParams(
            # batch axis shards across TensorCores (v7x); HW is the reduction.
            dimension_semantics=("parallel", "arbitrary"),
            vmem_limit_bytes=vmem_limit,
        ),
        cost_estimate=cost,
    )(x3, w_stack, wf_t)
    return att.reshape(B, C)


def sae_layer(x, w_stack, wf_t, *, hw_tile=None):
    """Full SaELayer.forward: expand_as(x) of the channel attention.

    The broadcast is done in the wrapper (not in the kernel) so the redundant
    B*C*H*W write can be fused by XLA into the downstream consumer."""
    B, C, H, W = x.shape
    att = sae_attention(x, w_stack, wf_t, hw_tile=hw_tile)
    return jnp.broadcast_to(att[:, :, None, None], (B, C, H, W))


def sae_layer_ref(x, w1, w2, w3, w4, wf):
    """Pure-JAX reference mirroring the PyTorch forward."""
    y = jnp.mean(x, axis=(2, 3))                          # (B, C)
    y1 = jax.nn.relu(y @ w1.T)
    y2 = jax.nn.relu(y @ w2.T)
    y3 = jax.nn.relu(y @ w3.T)
    y4 = jax.nn.relu(y @ w4.T)
    y_cat = jnp.concatenate([y1, y2, y3, y4], axis=1)     # (B, 4*hidden)
    att = jax.nn.sigmoid(y_cat @ wf.T)                    # (B, C)
    return jnp.broadcast_to(att[:, :, None, None], x.shape)


if __name__ == "__main__":
    # Module constraints: in_channel >= reduction and in_channel % reduction == 0.
    B, C = 2, 64
    reduction = 32
    hidden = C // reduction          # 2
    cardinality = 4

    key = jax.random.PRNGKey(0)
    kx, kx2, kx3, k1, k2, k3, k4, kf = jax.random.split(key, 8)

    # PyTorch Linear weight shape = (out_features, in_features).
    scale_branch = 1.0 / jnp.sqrt(jnp.float32(C))
    w1 = jax.random.normal(k1, (hidden, C), dtype=jnp.float32) * scale_branch
    w2 = jax.random.normal(k2, (hidden, C), dtype=jnp.float32) * scale_branch
    w3 = jax.random.normal(k3, (hidden, C), dtype=jnp.float32) * scale_branch
    w4 = jax.random.normal(k4, (hidden, C), dtype=jnp.float32) * scale_branch
    scale_fc = 1.0 / jnp.sqrt(jnp.float32(hidden * cardinality))
    wf = jax.random.normal(kf, (C, hidden * cardinality),
                           dtype=jnp.float32) * scale_fc

    w_stack, wf_t = prepare_sae_weights(w1, w2, w3, w4, wf)

    # Case 1: small, lane-aligned spatial (HW = 256, single tile per batch).
    x = jax.random.normal(kx, (B, C, 16, 16), dtype=jnp.float32)
    out = jax.block_until_ready(sae_layer(x, w_stack, wf_t))
    ref = sae_layer_ref(x, w1, w2, w3, w4, wf)
    assert out.shape == x.shape
    assert jnp.allclose(out, ref, atol=1e-4, rtol=1e-4), "mismatch (case 1)"

    # Case 2: ragged spatial (HW = 1600) with a forced small tile to exercise
    # the multi-tile accumulation path and the gated masked last tile.
    x2 = jax.random.normal(kx2, (B, C, 40, 40), dtype=jnp.float32)
    out2 = jax.block_until_ready(sae_layer(x2, w_stack, wf_t, hw_tile=512))
    ref2 = sae_layer_ref(x2, w1, w2, w3, w4, wf)
    assert out2.shape == x2.shape
    assert jnp.allclose(out2, ref2, atol=1e-4, rtol=1e-4), "mismatch (case 2)"

    # Case 3: larger aligned spatial (HW = 4096), natural byte-budget tiling.
    x3 = jax.random.normal(kx3, (B, C, 64, 64), dtype=jnp.float32)
    out3 = jax.block_until_ready(sae_layer(x3, w_stack, wf_t))
    ref3 = sae_layer_ref(x3, w1, w2, w3, w4, wf)
    assert out3.shape == x3.shape
    assert jnp.allclose(out3, ref3, atol=1e-4, rtol=1e-4), "mismatch (case 3)"

    print("KERNEL_OK")
</pallas_src>

<mosaic_0001>
module attributes {stable_mosaic.version = 11 : i64} {
  func.func @_sae_reduce_kernel(%arg0: i32, %arg1: i32, %arg2: memref<1x64x256xf32, #tpu.memory_space<vmem>>, %arg3: memref<64x8xf32, #tpu.memory_space<vmem>>, %arg4: memref<8x64xf32, #tpu.memory_space<vmem>>, %arg5: memref<1x1x64xf32, #tpu.memory_space<vmem>>, %arg6: memref<1x64xf32, #tpu.memory_space<vmem>>) attributes {dimension_semantics = [#tpu.dimension_semantics<parallel>, #tpu.dimension_semantics<arbitrary>], iteration_bounds = array<i64: 2, 1>, scalar_prefetch = 0 : i64, scratch_operands = 1 : i64, tpu.core_type = #tpu.core_type<tc>, window_params = [{transform_indices = @transform_0, window_bounds = array<i64: 1, 64, 256>}, {pipeline_mode = #tpu.pipeline_mode<synchronous>, transform_indices = @transform_1, window_bounds = array<i64: 64, 8>}, {pipeline_mode = #tpu.pipeline_mode<synchronous>, transform_indices = @transform_2, window_bounds = array<i64: 8, 64>}, {transform_indices = @transform_3, window_bounds = array<i64: 1, 1, 64>}]} {
    %c0_i32 = arith.constant 0 : i32
    %0 = arith.cmpi eq, %arg1, %c0_i32 : i32
    %1 = arith.extui %0 : i1 to i32
    %c0_i32_0 = arith.constant 0 : i32
    %2 = arith.cmpi ne, %1, %c0_i32_0 : i32
    scf.if %2 {
      %cst_9 = arith.constant 0.000000e+00 : f32
      %11 = vector.broadcast %cst_9 : f32 to vector<1x64xf32>
      %c0_10 = arith.constant 0 : index
      %c0_11 = arith.constant 0 : index
      %12 = vector.load %arg6[%c0_10, %c0_11] : memref<1x64xf32, #tpu.memory_space<vmem>>, vector<1x64xf32>
      tpu.vector_store %arg6[%c0_10, %c0_11], %11 {strides = array<i32>} : memref<1x64xf32, #tpu.memory_space<vmem>>, vector<1x64xf32>,
    } else {
    }
    %c0 = arith.constant 0 : index
    %c0_1 = arith.constant 0 : index
    %c0_2 = arith.constant 0 : index
    %3 = vector.load %arg2[%c0, %c0_1, %c0_2] : memref<1x64x256xf32, #tpu.memory_space<vmem>>, vector<1x64x256xf32>
    %c0_3 = arith.constant 0 : index
    %c0_4 = arith.constant 0 : index
    %4 = vector.load %arg6[%c0_3, %c0_4] : memref<1x64xf32, #tpu.memory_space<vmem>>, vector<1x64xf32>
    %cst = arith.constant dense<0.000000e+00> : vector<1x64xf32>
    %5 = vector.multi_reduction <add>, %3, %cst [2] : vector<1x64x256xf32> to vector<1x64xf32>
    %6 = arith.addf %4, %5 : vector<1x64xf32>
    %c0_5 = arith.constant 0 : index
    %c0_6 = arith.constant 0 : index
    %7 = vector.load %arg6[%c0_5, %c0_6] : memref<1x64xf32, #tpu.memory_space<vmem>>, vector<1x64xf32>
    tpu.vector_store %arg6[%c0_5, %c0_6], %6 {strides = array<i32>} : memref<1x64xf32, #tpu.memory_space<vmem>>, vector<1x64xf32>,
    %c0_i32_7 = arith.constant 0 : i32
    %8 = arith.cmpi eq, %arg1, %c0_i32_7 : i32
    %9 = arith.extui %8 : i1 to i32
    %c0_i32_8 = arith.constant 0 : i32
    %10 = arith.cmpi ne, %9, %c0_i32_8 : i32
    scf.if %10 {
      %c0_9 = arith.constant 0 : index
      %c0_10 = arith.constant 0 : index
      %11 = vector.load %arg6[%c0_9, %c0_10] : memref<1x64xf32, #tpu.memory_space<vmem>>, vector<1x64xf32>
      %cst_11 = arith.constant 3.906250e-03 : f32
      %12 = vector.broadcast %cst_11 : f32 to vector<1x64xf32>
      %13 = arith.mulf %11, %12 : vector<1x64xf32>
      %c0_12 = arith.constant 0 : index
      %c0_13 = arith.constant 0 : index
      %14 = vector.load %arg3[%c0_12, %c0_13] : memref<64x8xf32, #tpu.memory_space<vmem>>, vector<64x8xf32>
      %cst_14 = arith.constant dense<0.000000e+00> : vector<1x8xf32>
      %15 = tpu.matmul %13, %14, %cst_14 {dimension_numbers = #tpu.dot_dimension_numbers<[1], [0], [0], [1], [0, 0, 1, 1], [], []>} : vector<1x64xf32>, vector<64x8xf32>, vector<1x8xf32> -> vector<1x8xf32>
      %cst_15 = arith.constant 0.000000e+00 : f32
      %16 = vector.broadcast %cst_15 : f32 to vector<1x8xf32>
      %17 = arith.maximumf %15, %16 : vector<1x8xf32>
      %c0_16 = arith.constant 0 : index
      %c0_17 = arith.constant 0 : index
      %18 = vector.load %arg4[%c0_16, %c0_17] : memref<8x64xf32, #tpu.memory_space<vmem>>, vector<8x64xf32>
      %cst_18 = arith.constant dense<0.000000e+00> : vector<1x64xf32>
      %19 = tpu.matmul %17, %18, %cst_18 {dimension_numbers = #tpu.dot_dimension_numbers<[1], [0], [0], [1], [0, 0, 1, 1], [], []>} : vector<1x8xf32>, vector<8x64xf32>, vector<1x64xf32> -> vector<1x64xf32>
      %20 = arith.negf %19 : vector<1x64xf32>
      %21 = math.exp %20 : vector<1x64xf32>
      %cst_19 = arith.constant 1.000000e+00 : f32
      %22 = vector.broadcast %cst_19 : f32 to vector<1x64xf32>
      %23 = arith.addf %22, %21 : vector<1x64xf32>
      %24 = arith.divf %22, %23 : vector<1x64xf32>
      %25 = vector.shape_cast %24 : vector<1x64xf32> to vector<1x1x64xf32>
      %c0_20 = arith.constant 0 : index
      %c0_21 = arith.constant 0 : index
      %c0_22 = arith.constant 0 : index
      %26 = vector.load %arg5[%c0_20, %c0_21, %c0_22] : memref<1x1x64xf32, #tpu.memory_space<vmem>>, vector<1x1x64xf32>
      tpu.vector_store %arg5[%c0_20, %c0_21, %c0_22], %25 {strides = array<i32>} : memref<1x1x64xf32, #tpu.memory_space<vmem>>, vector<1x1x64xf32>,
    } else {
    }
    return
  }
  func.func @transform_0(%arg0: i32, %arg1: i32) -> (i32, i32, i32) {
    %c0_i32 = arith.constant 0 : i32
    %c0_i32_0 = arith.constant 0 : i32
    return %arg0, %c0_i32, %arg1 : i32, i32, i32
  }
  func.func @transform_1(%arg0: i32, %arg1: i32) -> (i32, i32) {
    %c0_i32 = arith.constant 0 : i32
    %c0_i32_0 = arith.constant 0 : i32
    %c0_i32_1 = arith.constant 0 : i32
    return %c0_i32, %c0_i32_0 : i32, i32
  }
  func.func @transform_2(%arg0: i32, %arg1: i32) -> (i32, i32) {
    %c0_i32 = arith.constant 0 : i32
    %c0_i32_0 = arith.constant 0 : i32
    %c0_i32_1 = arith.constant 0 : i32
    return %c0_i32, %c0_i32_0 : i32, i32
  }
  func.func @transform_3(%arg0: i32, %arg1: i32) -> (i32, i32, i32) {
    %c0_i32 = arith.constant 0 : i32
    %c0_i32_0 = arith.constant 0 : i32
    %c0_i32_1 = arith.constant 0 : i32
    return %arg0, %c0_i32, %c0_i32_0 : i32, i32, i32
  }
}

</mosaic_0001>

<bundles_post_ra>
// kernel: tpu_custom_call.1
= control target key start
LH: loop header
LB: loop body
LE: loop exit
PB: predicated region body
PF: predicated region fallthrough
CT: control target
= control target key end

     0   :  { %8 = vsyncpa [#allocation4], 0  ;;  %s1850_s0 = inlined_call_operand.hbm [shape: f32[2,64,256], index: 0, kind: input, shape index: {}]   ;;  %s1851_s1 = inlined_call_operand.vmem [shape: f32[64,8], index: 1, kind: input, shape index: {}]   ;;  %s1852_s2 = inlined_call_operand.vmem [shape: f32[8,64], index: 2, kind: input, shape index: {}]   ;;  %s1853_s3 = inlined_call_operand.hbm [shape: f32[2,1,64], index: 3, kind: output, shape index: {}]  }
   0x1   :  { %10 = vsyncpa [#allocation4 + $0x1], 0 }
   0x2   :  { %11 = vsyncpa [#allocation5], 0 }
   0x3   :  { %13 = vsyncpa [#allocation5 + $0x1], 0  ;;  %s1528_s12 = smov 0   ;;  %s1530_s13 = smov 0  }
   0x4   :  { %s1532_s14 = smov 0   ;;  %s1534_s15 = smov 0  }
   0x5   :  { %s1536_s16 = smov 0   ;;  %s1538_s17 = smov 0  }
   0x6 LB: > { %s1265_s18 = sadd.s32 4294967295, %s1498_s17   ;;  %s1266_s19 = sadd.s32 4294967294, %s1498_s17   ;;  %s1498_s17 = sphi %s1538_s17, %s19_s17   ;;  %s1494_s16 = sphi %s1536_s16, %s1864_s16   ;;  %s1490_s15 = sphi %s1534_s15, %s1863_s15   ;;  %s1486_s14 = sphi %s1532_s14, %s1862_s14   ;;  %s1482_s13 = sphi %s1530_s13, %s1861_s13   ;;  %s1478_s12 = sphi %s1528_s12, %s1860_s12  }
   0x7   : > { %s31_s20 = sadd.s32 1, %s1494_s16  ;;  %s40_s21 = sadd.s32 1, %s1486_s14 }
   0x8   : > { %p33_p0 = scmp.ge.s32.totalorder %s31_s20, 2  ;;  %p47_p1 = scmp.ne.s32.totalorder %s1486_s14, %s1482_s13 }
   0x9   : > { %p48_p2 = scmp.eq.s32.totalorder %s1498_s17, 0  ;;  %p53_p3 = scmp.ne.s32.totalorder %s1482_s13, %s1478_s12 }
   0xa   : > { %s1866_s20 = smov (%p33_p0, %s31_s20), 0  ;;  %p54_p5 = scmp.eq.s32.totalorder %s1265_s18, 0 }
   0xb   : > { %p1569_p4 = por %p48_p2, %p47_p1  ;;  %s35_s23 = ssub.s32 %s1494_s16, %s1866_s20 }
   0xc   : > { %p119_p6 = scmp.eq.s32.totalorder %s1265_s18, 1  ;;  %p38_p7 = scmp.eq.s32.totalorder %s35_s23, 0 }
   0xd   : > { %p1575_p8 = por %p54_p5, %p53_p3  ;;  %p125_p10 = scmp.eq.s32.totalorder %s1266_s19, 1 }
   0xe   : > { %p1579_p9 = por %p119_p6, %p47_p1  ;;  %p1328_p13 = scmp.lt.s32.totalorder %s1498_s17, 2 }
   0xf   : > { %s1584_s26 = scalar_select %p38_p7, %s1486_s14, %s40_s21  }
  0x10   : > { %p1586_p11 = por %p125_p10, %p53_p3  ;;  %s151_s28 = sand.u32 1, %s1486_s14  }
  0x11   : > { %s1269_s29 = sshll.u32 %s151_s28, 7  ;;  %s1280_s30 = sshll.u32 %s1494_s16, 11 }
  0x12   : > { %s163_s6 = scalar_lea.hbm %s1850_s0, %s1280_s30  ;;  %s155_s7 = scalar_lea.vmem [#allocation3], %s1269_s29 }
  0x13   : > { %s164_s8 = sshll.u32 %s155_s7, 4  ;;  %p1599_p0 = pnand %p1328_p13, %p1569_p4  ;;  %s165_s8 = int_to_ptr.vmem [resolvable:$true] %s164_s8 }
  0x14   : > { %p1272_p1 = scmp.ge.s32.totalorder %s1498_s17, 1  ;;  %s152_s10 = scalar_lea.sflag [#allocation4], %s151_s28 }
  0x15   : > { %p1392_p2 = pneg %p1599_p0  ;;  %s1403_s11 = scalar_lea.vmem %s165_s8, 2048 }
  0x16   : > { %p1404_p3 = scmp.ne.s32.totalorder %s165_s8, %s1403_s11  ;;  %s1500_s18 = smov [#allocation3]  }
  0x17   : > { %s1408_s19 = sshll.u32 %s1500_s18, 4  ;;  %s1409_s19 = int_to_ptr.vmem [resolvable:$false] %s1408_s19 }
  0x18   : > { %p1406_p5 = pnand %p1404_p3, %p1392_p2  ;;  %s1410_s21 = scalar_lea.vmem %s1409_s19, 4096 }
  0x19   : > { %p1411_p7 = scmp.lt.s32.totalorder %s165_s8, %s1409_s19  ;;  %p1412_p10 = scmp.lt.s32.totalorder %s1410_s21, %s1403_s11 }
  0x1a   : > { %p1407_p6 = pneg %p1406_p5 }
  0x1b   : > { %p1413_p12 = por %p1412_p10, %p1411_p7 }
  0x1d   : > { %p1414_p4 = pnand %p1413_p12, %p1407_p6 }
  0x1f   : > { %1417 = shalt.err (!%p1414_p4)
}
  0x20   : > { %s1501_s22 = smov 256   ;;  %s1502_s23 = smov 16  }
  0x21   : > { %1323 = dma.hbm_to_vmem [thread:$0]  (!%p1599_p0), %s163_s6, 2048, %s165_s8, %s152_s10, %s1501_s22, %s1501_s22, %s1502_s23  }
  0x22   : > { %p172_p13 = scmp.lt.s32.totalorder %s1498_s17, 3 }
  0x24   : > { %p173_p2 = pnand %p1272_p1, %p172_p13 }
  0x25   : > { %s1612_s28 = sand.u32 (!%p173_p2), 1, %s1482_s13  }
  0x26   : > { %176 = sbr.rel (%p173_p2) target bundleno = 810 (0x32a), region = 32  ;;  %s1273_s29 = sshll.u32 (!%p173_p2), %s1612_s28, 7 }
  0x27   : > { %s179_s30 = scalar_lea.sflag (!%p173_p2), [#allocation4], %s1612_s28  ;;  %s182_s4 = scalar_lea.vmem (!%p173_p2), [#allocation3], %s1273_s29 }
  0x2b   : > { %1469 = dma.done.wait (%p1575_p8), %s179_s30, 2048  }
  0x2c   : > { %1471 = vsyncadd (%p1575_p8), %s179_s30, 4294965248  ;;  %v211_v0 = vld [vmem:[%s182_s4] sm:$0xff]  ;;  %v212_v1 = vld [vmem:[%s182_s4 + $0x8] sm:$0xff]  ;;  %v1503_v24 = vmov 0   ;;  %v260_v25 = vlaneseq  ;;  %v1504_v26 = vmov 1966171168  }
  0x2d   : > { %v213_v2 = vld [vmem:[%s182_s4 + $0x10] sm:$0xff]  ;;  %v228_v3 = vadd.f32 %v212_v1, %v211_v0  ;;  %v214_v4 = vld [vmem:[%s182_s4 + $0x18] sm:$0xff]  ;;  %v215_v5 = vld [vmem:[%s182_s4 + $0x20] sm:$0xff]  ;;  %1384 = vset.pattern.permute.xlu0 %v1503_v24  ;;  %1385 = vset.pattern.permute.xlu1 %v1503_v24  ;;  %v521_v27 = vunpack.c.l.s4 %v1504_v26  ;;  %vm209_vm0 = vcmask 516096   ;;  %vm1506_vm1 = vmmov 0   ;;  %s1277_s6 = sshll.u32 %s1490_s15, 4 }
  0x2e   : > { %v216_v6 = vld [vmem:[%s182_s4 + $0x28] sm:$0xff]  ;;  %v217_v8 = vld [vmem:[%s182_s4 + $0x30] sm:$0xff]  ;;  %v218_v9 = vld [vmem:[%s182_s4 + $0x38] sm:$0xff]  ;;  %v231_v10 = vadd.f32 %v214_v4, %v213_v2  ;;  %v1621_v28 = vshrl.u32 %v260_v25, 7  ;;  %vm943_vm2 = vcmask 130112   ;;  %vm950_vm3 = vcmask 195712   ;;  %s1807_s11 = scalar_lea.hbm %s1853_s3, %s1277_s6 }
  0x2f   : > { %v234_v7 = vadd.f32 %v216_v6, %v215_v5  ;;  %229 = vadd.xlane.f32.xlu0 %v228_v3  ;;  %v237_v11 = vadd.f32 %v218_v9, %v217_v8  ;;  %v219_v12 = vld [vmem:[%s182_s4 + $0x40] sm:$0xff]  ;;  %v220_v13 = vld [vmem:[%s182_s4 + $0x48] sm:$0xff]  ;;  %v221_v14 = vld [vmem:[%s182_s4 + $0x50] sm:$0xff]  ;;  %v522_v29 = vunpack.c.0.s8 %v521_v27  ;;  %vm957_vm4 = vcmask 261312   ;;  %s203_s7 = scalar_lea.vmem [#allocation6], %s1612_s28  ;;  %s1176_s18 = scalar_lea.sflag [#allocation5], %s1612_s28 }
  0x30   : > { %v222_v15 = vld [vmem:[%s182_s4 + $0x58] sm:$0xff]  ;;  %v240_v16 = vadd.f32 %v220_v13, %v219_v12  ;;  %v223_v18 = vld [vmem:[%s182_s4 + $0x60] sm:$0xff]  ;;  %v224_v19 = vld [vmem:[%s182_s4 + $0x68] sm:$0xff]  ;;  %v1624_v30 = vsub.s32 0, %v1621_v28  ;;  %v1627_v31 = vsub.s32 1, %v1621_v28  ;;  %v1630_v32 = vsub.s32 2, %v1621_v28 }
  0x31   : > { %235 = vadd.xlane.f32.xlu1 %v234_v7  ;;  %v243_v17 = vadd.f32 %v222_v15, %v221_v14  ;;  %v225_v20 = vld [vmem:[%s182_s4 + $0x70] sm:$0xff]  ;;  %v226_v21 = vld [vmem:[%s182_s4 + $0x78] sm:$0xff]  ;;  %v246_v22 = vadd.f32 %v224_v19, %v223_v18  ;;  %v1633_v33 = vsub.s32 3, %v1621_v28  ;;  %v1636_v34 = vsub.s32 4, %v1621_v28  ;;  %s1188_s8 = sshll.u32 %s203_s7, 4  ;;  %s1507_s21 = smov [#allocation6]   ;;  %s1189_s8 = int_to_ptr.vmem [resolvable:$true] %s1188_s8 }
  0x32   : > { %v249_v23 = vadd.f32 %v226_v21, %v225_v20  ;;  %v1639_v35 = vsub.s32 5, %v1621_v28  ;;  %v1642_v36 = vsub.s32 6, %v1621_v28  ;;  %v1645_v37 = vsub.s32 7, %v1621_v28  ;;  %s1418_s19 = scalar_lea.vmem %s1189_s8, 16  ;;  %s1422_s22 = sshll.u32 %s1507_s21, 4  ;;  %s1423_s22 = int_to_ptr.vmem [resolvable:$false] %s1422_s22 }
  0x33   : > { %232 = vadd.xlane.f32.xlu0 %v231_v10  ;;  %v1648_v39 = vsub.s32 %v522_v29, %v1621_v28  ;;  %vm964_vm5 = vcmask 326912   ;;  %vm971_vm6 = vcmask 392512   ;;  %vm978_vm7 = vcmask 458112   ;;  %p1419_p8 = scmp.ne.s32.totalorder %s1189_s8, %s1418_s19  ;;  %s1424_s15 = scalar_lea.vmem %s1423_s22, 32 }
  0x34   : > { %vm985_vm8 = vcmask 523712   ;;  %vm1018_vm9 = vcmask 523264   ;;  %vm1094_vm10 = vcmask 64512   ;;  %p1425_p1 = scmp.lt.s32.totalorder %s1189_s8, %s1423_s22  ;;  %p1426_p3 = scmp.lt.s32.totalorder %s1424_s15, %s1418_s19 }
  0x35   : > { %238 = vadd.xlane.f32.xlu1 %v237_v11  ;;  %p1420_p12 = pnand %p1419_p8, %p1579_p9 }
  0x36   : > { %p1427_p5 = por %p1426_p3, %p1425_p1 }
  0x37   : > { %241 = vadd.xlane.f32.xlu0 %v240_v16  ;;  %p1421_p0 = pneg %p1420_p12 }
  0x39   : > { %244 = vadd.xlane.f32.xlu1 %v243_v17  ;;  %p1428_p6 = pnand %p1427_p5, %p1421_p0 }
  0x3b   : > { %247 = vadd.xlane.f32.xlu0 %v246_v22 }
  0x3d   : > { %250 = vadd.xlane.f32.xlu1 %v249_v23 }
  0xb8   : > { %v230_v38 = vpop.xlane.xlu0 %229 }
  0xb9   : > { %v263_v41 = vrot.slane %v230_v38, %v1624_v30  ;;  %v267_v42 = vrot.slane %v230_v38, %v1627_v31  ;;  %v271_v43 = vrot.slane %v230_v38, %v1630_v32  ;;  %v275_v44 = vrot.slane %v230_v38, %v1633_v33 }
  0xba   : > { %v236_v40 = vpop.xlane.xlu1 %235  ;;  %v279_v45 = vrot.slane %v230_v38, %v1636_v34  ;;  %v283_v46 = vrot.slane %v230_v38, %v1639_v35  ;;  %v287_v47 = vrot.slane %v230_v38, %v1642_v36  ;;  %v291_v48 = vrot.slane %v230_v38, %v1645_v37 }
  0xbb   : > { %v516_v49 = vcombine.low %v263_v41, %v267_v42  ;;  %v517_v50 = vcombine.low %v271_v43, %v275_v44  ;;  %v327_v51 = vrot.slane %v236_v40, %v1624_v30  ;;  %v331_v52 = vrot.slane %v236_v40, %v1627_v31 }
  0xbc   : > { %v233_v53 = vpop.xlane.xlu0 %232  ;;  %v518_v54 = vcombine.low %v279_v45, %v283_v46  ;;  %v519_v55 = vcombine.low %v287_v47, %v291_v48  ;;  %v335_v56 = vrot.slane %v236_v40, %v1630_v32  ;;  %v339_v57 = vrot.slane %v236_v40, %v1633_v33 }
  0xbd   : > { %v526_v58 = vrot.slane %v516_v49, %v1648_v39  ;;  %v533_v59 = vrot.slane %v517_v50, %v1648_v39  ;;  %v295_v60 = vrot.slane %v233_v53, %v1624_v30  ;;  %v299_v61 = vrot.slane %v233_v53, %v1627_v31 }
  0xbe   : > { %v540_v62 = vrot.slane %v518_v54, %v1648_v39  ;;  %v547_v63 = vrot.slane %v519_v55, %v1648_v39  ;;  %v303_v0 = vrot.slane %v233_v53, %v1630_v32  ;;  %v307_v1 = vrot.slane %v233_v53, %v1633_v33  ;;  %v239_v14 = vpop.xlane.xlu1 %238 }
  0xbf   : > { %v548_v2 = vcombine.low %v526_v58, %v533_v59  ;;  %v311_v3 = vrot.slane %v233_v53, %v1636_v34  ;;  %v315_v4 = vrot.slane %v233_v53, %v1639_v35  ;;  %v319_v5 = vrot.slane %v233_v53, %v1642_v36 }
  0xc0   : > { %v549_v6 = vcombine.low %v540_v62, %v547_v63  ;;  %v323_v7 = vrot.slane %v233_v53, %v1645_v37  ;;  %v565_v8 = vcombine.low %v295_v60, %v299_v61  ;;  %v566_v9 = vcombine.low %v303_v0, %v307_v1  ;;  %v242_v50 = vpop.xlane.xlu0 %241 }
  0xc1   : > { %v556_v10 = vrot.slane %v548_v2, %v1648_v39  ;;  %v567_v11 = vcombine.low %v311_v3, %v315_v4  ;;  %v343_v12 = vrot.slane %v236_v40, %v1636_v34  ;;  %v347_v13 = vrot.slane %v236_v40, %v1639_v35 }
  0xc2   : > { %v563_v15 = vrot.slane %v549_v6, %v1648_v39  ;;  %v568_v16 = vcombine.low %v319_v5, %v323_v7  ;;  %v575_v17 = vrot.slane %v565_v8, %v1648_v39  ;;  %v582_v18 = vrot.slane %v566_v9, %v1648_v39  ;;  %v245_v3 = vpop.xlane.xlu1 %244 }
  0xc3   : > { %v589_v19 = vrot.slane %v567_v11, %v1648_v39  ;;  %v351_v20 = vrot.slane %v236_v40, %v1642_v36  ;;  %v355_v21 = vrot.slane %v236_v40, %v1645_v37  ;;  %v614_v22 = vcombine.low %v327_v51, %v331_v52 }
  0xc4   : > { %v564_v23 = vcombine.low %v556_v10, %v563_v15  ;;  %v596_v24 = vrot.slane %v568_v16, %v1648_v39  ;;  %v597_v26 = vcombine.low %v575_v17, %v582_v18  ;;  %v615_v27 = vcombine.low %v335_v56, %v339_v57 }
  0xc5   : > { %v616_v29 = vcombine.low %v343_v12, %v347_v13  ;;  %v617_v38 = vcombine.low %v351_v20, %v355_v21  ;;  %v624_v41 = vrot.slane %v614_v22, %v1648_v39  ;;  %v359_v42 = vrot.slane %v239_v14, %v1624_v30 }
  0xc6   : > { %909 = vperm.xlu0 %1384, %v564_v23   ;;  %v598_v43 = vcombine.low %v589_v19, %v596_v24  ;;  %v605_v44 = vrot.slane %v597_v26, %v1648_v39  ;;  %v631_v45 = vrot.slane %v615_v27, %v1648_v39  ;;  %v363_v40 = vrot.slane %v239_v14, %v1627_v31 }
  0xc7   : > { %v638_v46 = vrot.slane %v616_v29, %v1648_v39  ;;  %v645_v47 = vrot.slane %v617_v38, %v1648_v39  ;;  %v367_v48 = vrot.slane %v239_v14, %v1630_v32  ;;  %v371_v49 = vrot.slane %v239_v14, %v1633_v33  ;;  %v248_v38 = vpop.xlane.xlu0 %247 }
  0xc8   : > { %v612_v51 = vrot.slane %v598_v43, %v1648_v39  ;;  %v646_v52 = vcombine.low %v624_v41, %v631_v45  ;;  %v375_v53 = vrot.slane %v239_v14, %v1636_v34  ;;  %v379_v54 = vrot.slane %v239_v14, %v1639_v35 }
  0xc9   : > { %v647_v55 = vcombine.low %v638_v46, %v645_v47  ;;  %v383_v56 = vrot.slane %v239_v14, %v1642_v36  ;;  %v387_v57 = vrot.slane %v239_v14, %v1645_v37  ;;  %v663_v58 = vcombine.low %v359_v42, %v363_v40 }
  0xca   : > { %v613_v59 = vcombine.low %v605_v44, %v612_v51  ;;  %v654_v60 = vrot.slane %v646_v52, %v1648_v39  ;;  %v664_v61 = vcombine.low %v367_v48, %v371_v49  ;;  %v665_v62 = vcombine.low %v375_v53, %v379_v54 }
  0xcb   : > { %v661_v63 = vrot.slane %v647_v55, %v1648_v39  ;;  %v666_v0 = vcombine.low %v383_v56, %v387_v57  ;;  %v673_v1 = vrot.slane %v663_v58, %v1648_v39  ;;  %v391_v2 = vrot.slane %v242_v50, %v1624_v30 }
  0xcc   : > { %912 = vperm.xlu1 %1385, %v613_v59   ;;  %v680_v4 = vrot.slane %v664_v61, %v1648_v39  ;;  %v687_v5 = vrot.slane %v665_v62, %v1648_v39  ;;  %v395_v6 = vrot.slane %v242_v50, %v1627_v31  ;;  %v399_v7 = vrot.slane %v242_v50, %v1630_v32 }
  0xcd   : > { %v662_v8 = vcombine.low %v654_v60, %v661_v63  ;;  %v694_v9 = vrot.slane %v666_v0, %v1648_v39  ;;  %v403_v10 = vrot.slane %v242_v50, %v1633_v33  ;;  %v407_v11 = vrot.slane %v242_v50, %v1636_v34  ;;  %v251_v60 = vpop.xlane.xlu1 %250 }
  0xce   : > { %v695_v12 = vcombine.low %v673_v1, %v680_v4  ;;  %v411_v13 = vrot.slane %v242_v50, %v1639_v35  ;;  %v415_v14 = vrot.slane %v242_v50, %v1642_v36  ;;  %v419_v15 = vrot.slane %v242_v50, %v1645_v37 }
  0xcf   : > { %v696_v16 = vcombine.low %v687_v5, %v694_v9  ;;  %v712_v17 = vcombine.low %v391_v2, %v395_v6  ;;  %v713_v18 = vcombine.low %v399_v7, %v403_v10  ;;  %v423_v19 = vrot.slane %v245_v3, %v1624_v30 }
  0xd0   : > { %915 = vperm.xlu1 %1385, %v662_v8   ;;  %v703_v20 = vrot.slane %v695_v12, %v1648_v39  ;;  %v714_v21 = vcombine.low %v407_v11, %v411_v13  ;;  %v715_v22 = vcombine.low %v415_v14, %v419_v15  ;;  %v427_v23 = vrot.slane %v245_v3, %v1627_v31 }
  0xd1   : > { %v710_v24 = vrot.slane %v696_v16, %v1648_v39  ;;  %v722_v26 = vrot.slane %v712_v17, %v1648_v39  ;;  %v729_v27 = vrot.slane %v713_v18, %v1648_v39  ;;  %v431_v29 = vrot.slane %v245_v3, %v1630_v32 }
  0xd2   : > { %v736_v41 = vrot.slane %v714_v21, %v1648_v39  ;;  %v743_v42 = vrot.slane %v715_v22, %v1648_v39  ;;  %v435_v43 = vrot.slane %v245_v3, %v1633_v33  ;;  %v439_v44 = vrot.slane %v245_v3, %v1636_v34 }
  0xd3   : > { %v711_v45 = vcombine.low %v703_v20, %v710_v24  ;;  %v744_v40 = vcombine.low %v722_v26, %v729_v27  ;;  %v443_v46 = vrot.slane %v245_v3, %v1639_v35  ;;  %v447_v47 = vrot.slane %v245_v3, %v1642_v36 }
  0xd4   : > { %v745_v48 = vcombine.low %v736_v41, %v743_v42  ;;  %v451_v49 = vrot.slane %v245_v3, %v1645_v37  ;;  %v761_v50 = vcombine.low %v423_v19, %v427_v23  ;;  %v762_v51 = vcombine.low %v431_v29, %v435_v43 }
  0xd5   : > { %918 = vperm.xlu1 %1385, %v711_v45   ;;  %v752_v52 = vrot.slane %v744_v40, %v1648_v39  ;;  %v763_v53 = vcombine.low %v439_v44, %v443_v46  ;;  %v455_v54 = vrot.slane %v248_v38, %v1624_v30  ;;  %v459_v55 = vrot.slane %v248_v38, %v1627_v31 }
  0xd6   : > { %v759_v56 = vrot.slane %v745_v48, %v1648_v39  ;;  %v764_v57 = vcombine.low %v447_v47, %v451_v49  ;;  %v771_v58 = vrot.slane %v761_v50, %v1648_v39  ;;  %v778_v59 = vrot.slane %v762_v51, %v1648_v39  ;;  %v1017_v49 = vld [vmem:[%s1851_s1 + $0x38] sm:$0xff]  ;;  %v1016_v50 = vld [vmem:[%s1851_s1 + $0x30] sm:$0xff]  ;;  %v1015_v51 = vld [vmem:[%s1851_s1 + $0x28] sm:$0xff] }
  0xd7   : > { %v785_v61 = vrot.slane %v763_v53, %v1648_v39  ;;  %v463_v62 = vrot.slane %v248_v38, %v1630_v32  ;;  %v467_v63 = vrot.slane %v248_v38, %v1633_v33  ;;  %v471_v0 = vrot.slane %v248_v38, %v1636_v34  ;;  %v1013_v53 = vld [vmem:[%s1851_s1 + $0x18] sm:$0xff] }
  0xd8   : > { %v760_v1 = vcombine.low %v752_v52, %v759_v56  ;;  %v792_v2 = vrot.slane %v764_v57, %v1648_v39  ;;  %v793_v3 = vcombine.low %v771_v58, %v778_v59  ;;  %v475_v4 = vrot.slane %v248_v38, %v1639_v35  ;;  %v1014_v52 = vld [vmem:[%s1851_s1 + $0x20] sm:$0xff] }
  0xd9   : > { %v479_v5 = vrot.slane %v248_v38, %v1642_v36  ;;  %v483_v6 = vrot.slane %v248_v38, %v1645_v37  ;;  %v810_v7 = vcombine.low %v455_v54, %v459_v55  ;;  %v811_v8 = vcombine.low %v463_v62, %v467_v63  ;;  %v1012_v54 = vld [vmem:[%s1851_s1 + $0x10] sm:$0xff]  ;;  %v1011_v55 = vld [vmem:[%s1851_s1 + $0x8] sm:$0xff]  ;;  %v1010_v56 = vld [vmem:[%s1851_s1] sm:$0xff] }
  0xda   : > { %921 = vperm.xlu1 %1385, %v760_v1   ;;  %v794_v9 = vcombine.low %v785_v61, %v792_v2  ;;  %v801_v10 = vrot.slane %v793_v3, %v1648_v39  ;;  %v812_v11 = vcombine.low %v471_v0, %v475_v4  ;;  %v487_v12 = vrot.slane %v251_v60, %v1624_v30 }
  0xdb   : > { %v813_v13 = vcombine.low %v479_v5, %v483_v6  ;;  %v820_v14 = vrot.slane %v810_v7, %v1648_v39  ;;  %v827_v15 = vrot.slane %v811_v8, %v1648_v39  ;;  %v491_v16 = vrot.slane %v251_v60, %v1627_v31 }
  0xdc   : > { %v808_v17 = vrot.slane %v794_v9, %v1648_v39  ;;  %v834_v18 = vrot.slane %v812_v11, %v1648_v39  ;;  %v495_v19 = vrot.slane %v251_v60, %v1630_v32  ;;  %v499_v20 = vrot.slane %v251_v60, %v1633_v33 }
  0xdd   : > { %v841_v21 = vrot.slane %v813_v13, %v1648_v39  ;;  %v842_v22 = vcombine.low %v820_v14, %v827_v15  ;;  %v503_v30 = vrot.slane %v251_v60, %v1636_v34  ;;  %v507_v23 = vrot.slane %v251_v60, %v1639_v35 }
  0xde   : > { %v809_v24 = vcombine.low %v801_v10, %v808_v17  ;;  %v511_v26 = vrot.slane %v251_v60, %v1642_v36  ;;  %v515_v31 = vrot.slane %v251_v60, %v1645_v37  ;;  %v859_v27 = vcombine.low %v487_v12, %v491_v16 }
  0xdf   : > { %v843_v29 = vcombine.low %v834_v18, %v841_v21  ;;  %v850_v38 = vrot.slane %v842_v22, %v1648_v39  ;;  %v860_v41 = vcombine.low %v495_v19, %v499_v20  ;;  %v861_v32 = vcombine.low %v503_v30, %v507_v23 }
  0xe0   : > { %924 = vperm.xlu1 %1385, %v809_v24   ;;  %v862_v33 = vcombine.low %v511_v26, %v515_v31  ;;  %v869_v42 = vrot.slane %v859_v27, %v1648_v39  ;;  %v1505_v48 = vmov 0.0   ;;  %v933_v60 = vand.u32 127, %v260_v25 }
  0xe1   : > { %v857_v43 = vrot.slane %v843_v29, %v1648_v39  ;;  %v876_v34 = vrot.slane %v860_v41, %v1648_v39  ;;  %v883_v35 = vrot.slane %v861_v32, %v1648_v39  ;;  %210 = vst.msk [vmem:[#allocation2] sm:$0x1] %vm209_vm0, %v1505_v48  ;;  %1292 = vmatprep.subr.mxu0 %v1505_v48 }
  0xe2   : > { %v890_v36 = vrot.slane %v862_v33, %v1648_v39  ;;  %1311 = vmatprep.subr.mxu1 %v1505_v48  ;;  %1293 = vmatpush3.msra.mxu0 %v1017_v49  ;;  %v938_v62 = vadd.s32 4294967288, %v933_v60  ;;  %v945_v63 = vadd.s32 4294967280, %v933_v60  ;;  %v952_v0 = vadd.s32 4294967272, %v933_v60 }
  0xe3   : > { %v858_v44 = vcombine.low %v850_v38, %v857_v43  ;;  %v891_v37 = vcombine.low %v869_v42, %v876_v34  ;;  %1294 = vmatprep.subr.mxu0 %v1505_v48  ;;  %1308 = vmatprep.mubr.msk.f32.mxu0 %vm1506_vm1, %v1505_v48  ;;  %v959_v1 = vadd.s32 4294967264, %v933_v60  ;;  %v966_v3 = vadd.s32 4294967256, %v933_v60  ;;  %v1093_v34 = vld [vmem:[%s1852_s2] sm:$0xff] }
  0xe4   : > { %v892_v45 = vcombine.low %v883_v35, %v890_v36  ;;  %1295 = vmatpush3.msra.mxu0 %v1016_v50  ;;  %1313 = vmatprep.mubr.msk.f32.mxu1 %vm1506_vm1, %v1505_v48  ;;  %v941_v2 = vsub.s32 %v938_v62, %v1621_v28  ;;  %v948_v4 = vsub.s32 %v945_v63, %v1621_v28  ;;  %v973_v6 = vadd.s32 4294967248, %v933_v60 }
  0xe5   : > { %927 = vperm.xlu1 %1385, %v858_v44   ;;  %v899_v40 = vrot.slane %v891_v37, %v1648_v39  ;;  %1296 = vmatprep.subr.mxu0 %v1505_v48  ;;  %v936_v7 = vsub.s32 %v933_v60, %v1621_v28  ;;  %v955_v8 = vsub.s32 %v952_v0, %v1621_v28  ;;  %v980_v12 = vadd.s32 4294967240, %v933_v60 }
  0xe6   : > { %v906_v46 = vrot.slane %v892_v45, %v1648_v39  ;;  %1297 = vmatpush3.msra.mxu0 %v1015_v51  ;;  %v962_v10 = vsub.s32 %v959_v1, %v1621_v28  ;;  %v969_v11 = vsub.s32 %v966_v3, %v1621_v28  ;;  %v976_v14 = vsub.s32 %v973_v6, %v1621_v28 }
  0xe7   : > { %1298 = vmatprep.subr.mxu0 %v1505_v48  ;;  %v983_v21 = vsub.s32 %v980_v12, %v1621_v28  ;;  %1312 = vmatpush3.msra.mxu1 %v1093_v34 }
  0xe8   : > { %v907_v47 = vcombine.low %v899_v40, %v906_v46  ;;  %1299 = vmatpush3.msra.mxu0 %v1014_v52  ;;  %v227_v32 = vld [vmem:[#allocation2] sm:$0x1] }
  0xe9   : > { %1300 = vmatprep.subr.mxu0 %v1505_v48 }
  0xea   : > { %930 = vperm.xlu1 %1385, %v907_v47   ;;  %1301 = vmatpush3.msra.mxu0 %v1013_v53 }
  0xeb   : > { %1302 = vmatprep.subr.mxu0 %v1505_v48 }
  0xec   : > { %1303 = vmatpush3.msra.mxu0 %v1012_v54 }
  0xed   : > { %1304 = vmatprep.subr.mxu0 %v1505_v48 }
  0xee   : > { %1305 = vmatpush3.msra.mxu0 %v1011_v55 }
  0xef   : > { %1306 = vmatprep.subr.mxu0 %v1505_v48 }
  0xf0   : > { %1307 = vmatpush3.msra.mxu0 %v1010_v56 }
 0x141   : > { %v910_v9 = vpop.permute.xlu0 %909 }
 0x142   : > { %v937_v15 = vrot.slane %v910_v9, %v936_v7 }
 0x147   : > { %v913_v57 = vpop.permute.xlu1 %912 }
 0x148   : > { %v942_v25 = vrot.slane %v913_v57, %v941_v2 }
 0x14a   : > { %v944_v19 = vsel %vm943_vm2, %v942_v25, %v937_v15 }
 0x14b   : > { %v916_v58 = vpop.permute.xlu1 %915 }
 0x14c   : > { %v949_v13 = vrot.slane %v916_v58, %v948_v4 }
 0x14e   : > { %v951_v22 = vsel %vm950_vm3, %v949_v13, %v944_v19 }
 0x150   : > { %v919_v59 = vpop.permute.xlu1 %918 }
 0x151   : > { %v956_v16 = vrot.slane %v919_v59, %v955_v8 }
 0x153   : > { %v958_v23 = vsel %vm957_vm4, %v956_v16, %v951_v22 }
 0x155   : > { %v922_v61 = vpop.permute.xlu1 %921 }
 0x156   : > { %v963_v18 = vrot.slane %v922_v61, %v962_v10 }
 0x158   : > { %v965_v24 = vsel %vm964_vm5, %v963_v18, %v958_v23 }
 0x15b   : > { %v925_v5 = vpop.permute.xlu1 %924 }
 0x15c   : > { %v970_v20 = vrot.slane %v925_v5, %v969_v11 }
 0x15e   : > { %v972_v31 = vsel %vm971_vm6, %v970_v20, %v965_v24 }
 0x160   : > { %v928_v17 = vpop.permute.xlu1 %927 }
 0x161   : > { %v977_v30 = vrot.slane %v928_v17, %v976_v14 }
 0x163   : > { %v979_v29 = vsel %vm978_vm7, %v977_v30, %v972_v31 }
 0x165   : > { %v931_v26 = vpop.permute.xlu1 %930 }
 0x166   : > { %v984_v27 = vrot.slane %v931_v26, %v983_v21 }
 0x168   : > { %v986_v38 = vsel %vm985_vm8, %v984_v27, %v979_v29 }
 0x169   : > { %v993_v41 = vrot.slane %v986_v38, %v1648_v39 }
 0x16b   : > { %v1000_v33 = vrot.slane %v993_v41, %v1648_v39 }
 0x16d   : > { %v1002_v42 = vadd.f32 %v1000_v33, %v227_v32 }
 0x16f   : > { %1004 = vst.msk [vmem:[#allocation2] sm:$0x1] %vm209_vm0, %v1002_v42 }
 0x176   : > { %v1008_v28 = vld [vmem:[#allocation2] sm:$0x1] }
 0x177   : > { %v1009_v43 = vmul.f32 0.00390625, %v1008_v28 }
 0x179   : > { %1309 = vmatmul.mubr.msk.f32.vlgmr.msra.gmra.mxu0 %vm1018_vm9, %v1009_v43 }
 0x239   : > { %v1088_v35 = vpop.f32.mrf.mxu0 }
 0x23a   : > { %v1092_v36 = vmax.f32 %v1088_v35, 0.0 }
 0x23b   : > { %v1310_v44 = vpop.f32.mrf.mxu0 }
 0x23c   : > { %1314 = vmatmul.mubr.msk.f32.vlgmr.msra.gmra.mxu1 %vm1094_vm10, %v1092_v36 }
 0x2fc   : > { %v1164_v39 = vpop.f32.mrf.mxu1 }
 0x2fd   : > { %v1276_v37 = vmul.f32 -1.442695, %v1164_v39 }
 0x2fe   : > { %v1315_v45 = vpop.f32.mrf.mxu1 }
 0x2ff   : > { %1386 = vpow2.f32 %v1276_v37 }
 0x30c   : > { %v1387_v40 = vpop.eup %1386 }
 0x30d   : > { %v1171_v46 = vadd.f32 1.0, %v1387_v40 }
 0x30f   : > { %1388 = vrcp.f32 %v1171_v46 }
 0x31c   : > { %v1389_v47 = vpop.eup %1388 }
 0x31d   : > { %1174 = vst.msk [vmem:[%s203_s7] sm:$0x1] %vm209_vm0, %v1389_v47 }
 0x31e   : > { %1431 = shalt.err (!%p1428_p6)
}
 0x31f   : > { %s1432_s23 = scalar_lea.hbm %s1807_s11, 16  ;;  %s1436_s30 = scalar_lea.hbm %s1853_s3, 32 }
 0x320   : > { %p1433_p7 = scmp.ne.s32.totalorder %s1807_s11, %s1432_s23  ;;  %p1437_p13 = scmp.lt.s32.totalorder %s1807_s11, %s1853_s3 }
 0x321   : > { %p1438_p2 = scmp.lt.s32.totalorder %s1436_s30, %s1432_s23 }
 0x322   : > { %p1434_p10 = pnand %p1433_p7, %p1579_p9 }
 0x323   : > { %p1439_p8 = por %p1438_p2, %p1437_p13 }
 0x324   : > { %p1435_p4 = pneg %p1434_p10 }
 0x326   : > { %p1440_p12 = pnand %p1439_p8, %p1435_p4 }
 0x328   : > { %1443 = shalt.err (!%p1440_p12)
}
 0x329   : > { %1318 = dma.vmem_to_hbm [thread:$0]  (%p1579_p9), %s1189_s8, 16, %s1807_s11, %s1176_s18  }
 0x32a PF: > { %s1200_s5 = sand.u32 1, %s1478_s12   ;;  %p1859_p0 = scmp.ge.s32.totalorder %s1498_s17, 2 }
 0x32b   : > { %s1201_s6 = scalar_lea.sflag [#allocation5], %s1200_s5 }
 0x32c   : > { %p1325_p1 = pnand %p1859_p0, %p1586_p11 }
 0x32e   : > { %p1326_p3 = pneg %p1325_p1 }
 0x330   : > { %1473 = dma.done.wait (%p1326_p3), %s1201_s6, 16  }
 0x331   : > { %1475 = vsyncadd (%p1326_p3), %s1201_s6, 4294967280  ;;  %s19_s17 = sadd.s32 1, %s1498_s17   ;;  %s1860_s12 = smov %s1482_s13 }
 0x332   : > { %p16_p5 = scmp.ge.s32.totalorder %s19_s17, 4   ;;  %s1861_s13 = smov %s1486_s14 }
 0x333   : > { %s1862_s14 = smov %s1584_s26  ;;  %s1863_s15 = smov %s1494_s16 }
 0x334   : > { %s1864_s16 = smov %s1866_s20  ;;  %18 = sbr.rel (!%p16_p5) target bundleno = 6 (0x6), region = 85 }
 0x339   :  { %1205 = vsyncpa [#allocation4], 1 }
 0x33a   :  { %1207 = vsyncpa [#allocation4 + $0x1], 1 }
 0x33b   :  { %1208 = vsyncpa [#allocation5], 1 }
 0x33c   :  { %1210 = vsyncpa [#allocation5 + $0x1], 1 }

</bundles_post_ra>
